<compile_context>
chip_gen: v6e
topology: v6e:2x2x1
jax: 0.10.0
libtpu: 0.0.40
codegen_flags: <defaults>
</compile_context>

<pallas_src>
import functools
import math

import jax
import jax.numpy as jnp
from jax.experimental import pallas as pl
from jax.experimental.pallas import tpu as pltpu


# --------------------------------- utilities ----------------------------------
@functools.lru_cache(maxsize=1)
def _vmem_limit_bytes():
    """Scoped-VMEM request: 3/4 of the chip's physical VMEM (v7x-safe default)."""
    cap = 64 * 1024 * 1024            # smallest per-core VMEM (v7x) as fallback
    try:
        cap = int(pltpu.get_tpu_info().vmem_capacity_bytes)
    except Exception:
        pass
    return (cap // 4) * 3


def _pick_tile(n, max_tile):
    """Largest tile <= max_tile dividing n, preferring 256/128/8 multiples."""
    if n <= max_tile:
        return n                       # full extent (always a legal block dim)
    for align in (256, 128, 8):
        t = (max_tile // align) * align
        while t >= align:
            if n % t == 0:
                return t
            t -= align
    if n <= 8 * max_tile:
        # TODO(synk): switch to a pl.cdiv grid + masked last tile for ragged sizes.
        return n
    raise ValueError(f"no aligned tile for extent {n} (max_tile={max_tile}); "
                     f"pad the input or add a masked last tile")


# --------------------------- fused linear: x @ W + b ---------------------------
def _linear_kernel(x_ref, w_ref, b_ref, o_ref):
    acc = jnp.dot(x_ref[...], w_ref[...], preferred_element_type=jnp.float32)
    o_ref[...] = (acc + b_ref[...].astype(jnp.float32)).astype(o_ref.dtype)


def linear_pallas(x2d, w, b, *, max_tile_rows=512):
    """x2d: (R, Din) @ w: (Din, Dout) + b: (Dout,) -> (R, Dout)."""
    R, Din = x2d.shape
    Dout = w.shape[1]
    tm = _pick_tile(R, max_tile_rows)
    # TODO(synk): tile Dout/Din (f32 accumulator + pl.when init/finalize) once
    # d_model is large enough that a resident f32 (Din, Dout) weight no longer
    # fits v7x's 64 MiB VMEM.
    return pl.pallas_call(
        _linear_kernel,
        out_shape=jax.ShapeDtypeStruct((R, Dout), x2d.dtype),
        grid=(R // tm,),
        in_specs=[
            pl.BlockSpec((tm, Din), lambda i: (i, 0)),
            pl.BlockSpec(memory_space=pltpu.MemorySpace.VMEM),   # W resident
            pl.BlockSpec(memory_space=pltpu.MemorySpace.VMEM),   # bias resident
        ],
        out_specs=pl.BlockSpec((tm, Dout), lambda i: (i, 0)),
        compiler_params=pltpu.CompilerParams(
            dimension_semantics=("parallel",),
            vmem_limit_bytes=_vmem_limit_bytes()),
    )(x2d, w, b.reshape(1, Dout))


# --------------------------- fused Q/K/V projection ----------------------------
def _qkv_proj_shared_kernel(x_ref, w_ref, b_ref, qo_ref, ko_ref, vo_ref, *, d_model):
    # Self-attention fast path: activation read once, one 3x-wide MXU pass.
    acc = jnp.dot(x_ref[...], w_ref[...], preferred_element_type=jnp.float32)
    out = acc + b_ref[...].astype(jnp.float32)
    qo_ref[...] = out[:, 0:d_model].astype(qo_ref.dtype)
    ko_ref[...] = out[:, d_model:2 * d_model].astype(ko_ref.dtype)
    vo_ref[...] = out[:, 2 * d_model:3 * d_model].astype(vo_ref.dtype)


def _qkv_proj_kernel(xq_ref, xk_ref, xv_ref, w_ref, b_ref,
                     qo_ref, ko_ref, vo_ref, *, d_model):
    b = b_ref[...].astype(jnp.float32)                    # (1, 3*d_model)

    def proj(x_ref, o_ref, col):
        w = w_ref[:, col:col + d_model]                   # resident-weight slice
        acc = jnp.dot(x_ref[...], w, preferred_element_type=jnp.float32)
        o_ref[...] = (acc + b[:, col:col + d_model]).astype(o_ref.dtype)

    proj(xq_ref, qo_ref, 0)
    proj(xk_ref, ko_ref, d_model)
    proj(xv_ref, vo_ref, 2 * d_model)


def qkv_projection_pallas(q2d, k2d, v2d, wqkv, bqkv, *, d_model, shared,
                          max_tile_rows=512):
    """Project q/k/v in a single pallas_call with the concat weight resident."""
    Rq, Din = q2d.shape
    Rk = k2d.shape[0]
    dt = q2d.dtype

    if Rq != Rk:
        # Cross-attention with Sq != Sk: fall back to per-tensor projections.
        q = linear_pallas(q2d, wqkv[:, 0:d_model], bqkv[0:d_model])
        k = linear_pallas(k2d, wqkv[:, d_model:2 * d_model], bqkv[d_model:2 * d_model])
        v = linear_pallas(v2d, wqkv[:, 2 * d_model:], bqkv[2 * d_model:])
        return q, k, v

    b2d = bqkv.reshape(1, 3 * d_model)
    tm = _pick_tile(Rq, max_tile_rows)
    grid = (Rq // tm,)
    w_spec = pl.BlockSpec(memory_space=pltpu.MemorySpace.VMEM)
    o_spec = pl.BlockSpec((tm, d_model), lambda i: (i, 0))
    out_shape = (jax.ShapeDtypeStruct((Rq, d_model), dt),
                 jax.ShapeDtypeStruct((Rk, d_model), dt),
                 jax.ShapeDtypeStruct((Rk, d_model), dt))

    if shared:
        kernel = functools.partial(_qkv_proj_shared_kernel, d_model=d_model)
        in_specs = [pl.BlockSpec((tm, Din), lambda i: (i, 0)), w_spec, w_spec]
        operands = (q2d, wqkv, b2d)
    else:
        kernel = functools.partial(_qkv_proj_kernel, d_model=d_model)
        x_spec = pl.BlockSpec((tm, Din), lambda i: (i, 0))
        in_specs = [x_spec, x_spec, x_spec, w_spec, w_spec]
        operands = (q2d, k2d, v2d, wqkv, b2d)

    return pl.pallas_call(
        kernel,
        out_shape=out_shape,
        grid=grid,
        in_specs=in_specs,
        out_specs=(o_spec, o_spec, o_spec),
        compiler_params=pltpu.CompilerParams(
            dimension_semantics=("parallel",),
            vmem_limit_bytes=_vmem_limit_bytes()),
    )(*operands)


# ------------------- flash-style attention (heads in lanes) --------------------
def _flash_attn_kernel(*refs, n_head, d_k, scale, has_bias, compute_dtype):
    if has_bias:
        bias_ref, q_ref, k_ref, v_ref, o_ref, m_sc, l_sc, acc_sc = refs
    else:
        q_ref, k_ref, v_ref, o_ref, m_sc, l_sc, acc_sc = refs
        bias_ref = None

    kv_i = pl.program_id(2)

    @pl.when(kv_i == 0)
    def _init():
        m_sc[...] = jnp.full_like(m_sc, -jnp.inf)
        l_sc[...] = jnp.zeros_like(l_sc)
        acc_sc[...] = jnp.zeros_like(acc_sc)

    q_all = q_ref[0]                                         # (tq,  H*d_k)
    k_all = k_ref[0]                                         # (tkv, H*d_k)
    v_all = v_ref[0]                                         # (tkv, H*d_k)
    if has_bias:
        bias = bias_ref[0].astype(jnp.float32)               # (tq, tkv)

    for h in range(n_head):                                  # static unroll
        lo = h * d_k
        hi = lo + d_k
        # Fold 1/sqrt(d_k) into Q (tq*d_k mults instead of tq*tkv), bf16 to MXU.
        qh = (q_all[:, lo:hi] * scale).astype(compute_dtype)
        kh = k_all[:, lo:hi].astype(compute_dtype)
        vh = v_all[:, lo:hi].astype(compute_dtype)

        s = jax.lax.dot_general(qh, kh, (((1,), (1,)), ((), ())),
                                preferred_element_type=jnp.float32)   # (tq, tkv)
        if has_bias:
            s = s + bias                                     # additive -1e9 bias

        m_prev = m_sc[h]                                     # (tq, 1) f32
        m_new = jnp.maximum(m_prev, jnp.max(s, axis=-1, keepdims=True))
        alpha = jnp.exp(m_prev - m_new)
        p = jnp.exp(s - m_new)                               # unnormalized probs
        l_sc[h] = alpha * l_sc[h] + jnp.sum(p, axis=-1, keepdims=True)
        m_sc[h] = m_new
        acc_sc[h] = alpha * acc_sc[h] + jnp.dot(
            p.astype(compute_dtype), vh, preferred_element_type=jnp.float32)

    @pl.when(kv_i == pl.num_programs(2) - 1)
    def _finalize():
        for h in range(n_head):
            inv_l = pl.reciprocal(l_sc[h], approx=True)      # EUP, post-PV scale
            o_ref[0, :, h * d_k:(h + 1) * d_k] = (
                acc_sc[h] * inv_l).astype(o_ref.dtype)


def mha_attention_pallas(q, k, v, bias, *, n_head, max_tile_q=256,
                         max_tile_kv=512, compute_dtype=jnp.bfloat16):
    """q: (B, Sq, d_model), k/v: (B, Sk, d_model) with heads packed in the last
    dim; bias: (B, Sq, Sk) additive bf16 bias or None. Returns (B, Sq, d_model)."""
    B, Sq, d_model = q.shape
    Sk = k.shape[1]
    assert d_model % n_head == 0
    d_k = d_model // n_head
    scale = 1.0 / math.sqrt(d_k)

    tq = _pick_tile(Sq, max_tile_q)
    tkv = _pick_tile(Sk, max_tile_kv)
    grid = (B, Sq // tq, Sk // tkv)                          # KV axis last

    q_spec = pl.BlockSpec((1, tq, d_model), lambda b, qi, ki: (b, qi, 0))
    kv_spec = pl.BlockSpec((1, tkv, d_model), lambda b, qi, ki: (b, ki, 0))
    o_spec = pl.BlockSpec((1, tq, d_model), lambda b, qi, ki: (b, qi, 0))

    kernel = functools.partial(_flash_attn_kernel, n_head=n_head, d_k=d_k,
                               scale=scale, has_bias=bias is not None,
                               compute_dtype=compute_dtype)
    if bias is not None:
        bias_spec = pl.BlockSpec((1, tq, tkv), lambda b, qi, ki: (b, qi, ki))
        in_specs = [bias_spec, q_spec, kv_spec, kv_spec]
        operands = (bias, q, k, v)
    else:
        in_specs = [q_spec, kv_spec, kv_spec]
        operands = (q, k, v)

    return pl.pallas_call(
        kernel,
        out_shape=jax.ShapeDtypeStruct((B, Sq, d_model), q.dtype),
        grid=grid,
        in_specs=in_specs,
        out_specs=o_spec,
        scratch_shapes=[
            pltpu.VMEM((n_head, tq, 1), jnp.float32),        # running max
            pltpu.VMEM((n_head, tq, 1), jnp.float32),        # running sum
            pltpu.VMEM((n_head, tq, d_k), jnp.float32),      # output accumulator
        ],
        compiler_params=pltpu.CompilerParams(
            dimension_semantics=("parallel", "parallel", "arbitrary"),
            vmem_limit_bytes=_vmem_limit_bytes()),
    )(*operands)


# ---------------------------- module-level wrapper -----------------------------
def multi_head_attention(params, query, key, value, mask, *, n_head,
                         output_linear=False):
    """query: (B, Sq, d_input); key/value: (B, Sk, d_input); mask: (B, Sq, Sk) or
    None (entries > 0 are masked out). Returns (B, Sq, d_model)."""
    B, Sq, d_input = query.shape
    Sk = key.shape[1]
    d_model = params["wq"].shape[1]
    assert d_model % n_head == 0

    wqkv = jnp.concatenate([params["wq"], params["wk"], params["wv"]], axis=1)
    bqkv = jnp.concatenate([params["bq"], params["bk"], params["bv"]])

    shared = (query is key) and (key is value)
    q, k, v = qkv_projection_pallas(
        query.reshape(B * Sq, d_input),
        key.reshape(B * Sk, d_input),
        value.reshape(B * Sk, d_input),
        wqkv, bqkv, d_model=d_model, shared=shared)

    # Keep (B, S, d_model): head h lives in columns [h*d_k, (h+1)*d_k).
    # No head split/merge transposes (pure reshapes, no data movement).
    q = q.reshape(B, Sq, d_model)
    k = k.reshape(B, Sk, d_model)
    v = v.reshape(B, Sk, d_model)

    bias = None
    if mask is not None:
        # Additive bf16 bias instead of an int32 mask DMA + compare/select.
        # Note: fully-masked rows give softmax(scores) here vs. uniform 1/Sk under
        # torch's masked_fill(-1e9); both are degenerate cases.
        mask = jnp.broadcast_to(mask, (B, Sq, Sk))
        bias = jnp.where(mask > 0, jnp.float32(-1e9),
                         jnp.float32(0.0)).astype(jnp.bfloat16)

    x = mha_attention_pallas(q, k, v, bias, n_head=n_head)   # (B, Sq, d_model)
    # TODO(synk): eval-mode forward; dropout on attention probs is identity here.

    if output_linear:
        x = linear_pallas(x.reshape(B * Sq, d_model), params["wo"], params["bo"])
        x = x.reshape(B, Sq, d_model)
    return x


# --------------------------------- reference -----------------------------------
def multi_head_attention_ref(params, query, key, value, mask, *, n_head,
                             output_linear=False):
    B, Sq, _ = query.shape
    Sk = key.shape[1]
    d_model = params["wq"].shape[1]
    d_k = d_model // n_head

    def proj(x, w, b):
        return jnp.dot(x, w) + b

    q = proj(query, params["wq"], params["bq"]).reshape(B, Sq, n_head, d_k).transpose(0, 2, 1, 3)
    k = proj(key, params["wk"], params["bk"]).reshape(B, Sk, n_head, d_k).transpose(0, 2, 1, 3)
    v = proj(value, params["wv"], params["bv"]).reshape(B, Sk, n_head, d_k).transpose(0, 2, 1, 3)
    scores = jnp.einsum("bhqd,bhkd->bhqk", q, k) / math.sqrt(d_k)
    if mask is not None:
        scores = jnp.where(mask[:, None, :, :] > 0, -1e9, scores)
    p = jax.nn.softmax(scores, axis=-1)
    x = jnp.einsum("bhqk,bhkd->bhqd", p, v)
    x = x.transpose(0, 2, 1, 3).reshape(B, Sq, d_model)
    if output_linear:
        x = jnp.dot(x, params["wo"]) + params["bo"]
    return x


if __name__ == "__main__":
    B, S, d_input, d_model, n_head = 2, 8, 32, 32, 4
    key0 = jax.random.PRNGKey(0)
    ks = jax.random.split(key0, 11)

    query = jax.random.normal(ks[0], (B, S, d_input), dtype=jnp.float32)
    key_in = jax.random.normal(ks[1], (B, S, d_input), dtype=jnp.float32)
    value = jax.random.normal(ks[2], (B, S, d_input), dtype=jnp.float32)

    def init_linear(kw, kb, din, dout):
        lim = 1.0 / math.sqrt(din)
        w = jax.random.uniform(kw, (din, dout), jnp.float32, -lim, lim)  # torch weight.T layout
        b = jax.random.uniform(kb, (dout,), jnp.float32, -lim, lim)
        return w, b

    wq, bq = init_linear(ks[3], ks[4], d_input, d_model)
    wk, bk = init_linear(ks[5], ks[6], d_input, d_model)
    wv, bv = init_linear(ks[7], ks[8], d_input, d_model)
    wo, bo = init_linear(ks[9], ks[10], d_model, d_model)
    params = dict(wq=wq, bq=bq, wk=wk, bk=bk, wv=wv, bv=bv, wo=wo, bo=bo)

    # mask[b, i, j] > 0 ==> masked out (matches torch masked_fill(mask > 0, -1e9)).
    future = (jnp.arange(S)[None, :] > jnp.arange(S)[:, None]).astype(jnp.int32)
    mask = jnp.broadcast_to(future, (B, S, S))

    # bf16 MXU inputs inside the attention kernel (per perf review) => compare
    # against the f32 reference with bf16-level tolerances.
    TOL = dict(atol=3e-2, rtol=3e-2)

    # 1) Masked attention over distinct q/k/v tensors, no output projection
    #    (module default output_linear=False); exercises the general fused-QKV
    #    path and the additive-bias kernel.
    out = multi_head_attention(params, query, key_in, value, mask, n_head=n_head)
    out = jax.block_until_ready(out)
    ref = multi_head_attention_ref(params, query, key_in, value, mask, n_head=n_head)
    assert out.shape == (B, S, d_model)
    assert jnp.allclose(out, ref, **TOL), "masked MHA mismatch vs reference"

    # 2) Self-attention (shared-activation fused QKV fast path), no mask, with
    #    the output projection (exercises mask=None kernel + 4th linear).
    out2 = multi_head_attention(params, query, query, query, None,
                                n_head=n_head, output_linear=True)
    out2 = jax.block_until_ready(out2)
    ref2 = multi_head_attention_ref(params, query, query, query, None,
                                    n_head=n_head, output_linear=True)
    assert jnp.allclose(out2, ref2, **TOL), "self-attn MHA (output_linear) mismatch"

    print("KERNEL_OK")
</pallas_src>

<mosaic_0001>
module attributes {stable_mosaic.version = 11 : i64} {
  func.func @_qkv_proj_kernel(%arg0: i32, %arg1: memref<16x32xf32, #tpu.memory_space<vmem>>, %arg2: memref<16x32xf32, #tpu.memory_space<vmem>>, %arg3: memref<16x32xf32, #tpu.memory_space<vmem>>, %arg4: memref<32x96xf32, #tpu.memory_space<vmem>>, %arg5: memref<1x96xf32, #tpu.memory_space<vmem>>, %arg6: memref<16x32xf32, #tpu.memory_space<vmem>>, %arg7: memref<16x32xf32, #tpu.memory_space<vmem>>, %arg8: memref<16x32xf32, #tpu.memory_space<vmem>>) attributes {dimension_semantics = [#tpu.dimension_semantics<parallel>], iteration_bounds = array<i64: 1>, scalar_prefetch = 0 : i64, scratch_operands = 0 : i64, tpu.core_type = #tpu.core_type<tc>, window_params = [{transform_indices = @transform_0, window_bounds = array<i64: 16, 32>}, {transform_indices = @transform_1, window_bounds = array<i64: 16, 32>}, {transform_indices = @transform_2, window_bounds = array<i64: 16, 32>}, {pipeline_mode = #tpu.pipeline_mode<synchronous>, transform_indices = @transform_3, window_bounds = array<i64: 32, 96>}, {pipeline_mode = #tpu.pipeline_mode<synchronous>, transform_indices = @transform_4, window_bounds = array<i64: 1, 96>}, {transform_indices = @transform_5, window_bounds = array<i64: 16, 32>}, {transform_indices = @transform_6, window_bounds = array<i64: 16, 32>}, {transform_indices = @transform_7, window_bounds = array<i64: 16, 32>}]} {
    %c0 = arith.constant 0 : index
    %c0_0 = arith.constant 0 : index
    %0 = vector.load %arg5[%c0, %c0_0] : memref<1x96xf32, #tpu.memory_space<vmem>>, vector<1x96xf32>
    %c0_1 = arith.constant 0 : index
    %c0_2 = arith.constant 0 : index
    %1 = vector.load %arg4[%c0_1, %c0_2] : memref<32x96xf32, #tpu.memory_space<vmem>>, vector<32x32xf32>
    %c0_3 = arith.constant 0 : index
    %c0_4 = arith.constant 0 : index
    %2 = vector.load %arg1[%c0_3, %c0_4] : memref<16x32xf32, #tpu.memory_space<vmem>>, vector<16x32xf32>
    %cst = arith.constant dense<0.000000e+00> : vector<16x32xf32>
    %3 = tpu.matmul %2, %1, %cst {dimension_numbers = #tpu.dot_dimension_numbers<[1], [0], [0], [1], [0, 0, 1, 1], [], []>} : vector<16x32xf32>, vector<32x32xf32>, vector<16x32xf32> -> vector<16x32xf32>
    %4 = vector.extract_strided_slice %0 {offsets = [0, 0], sizes = [1, 32], strides = [1, 1]} : vector<1x96xf32> to vector<1x32xf32>
    %5 = vector.broadcast %4 : vector<1x32xf32> to vector<16x32xf32>
    %6 = arith.addf %3, %5 : vector<16x32xf32>
    %c0_5 = arith.constant 0 : index
    %c0_6 = arith.constant 0 : index
    %7 = vector.load %arg6[%c0_5, %c0_6] : memref<16x32xf32, #tpu.memory_space<vmem>>, vector<16x32xf32>
    tpu.vector_store %arg6[%c0_5, %c0_6], %6 {strides = array<i32>} : memref<16x32xf32, #tpu.memory_space<vmem>>, vector<16x32xf32>,
    %c0_7 = arith.constant 0 : index
    %c32 = arith.constant 32 : index
    %8 = vector.load %arg4[%c0_7, %c32] : memref<32x96xf32, #tpu.memory_space<vmem>>, vector<32x32xf32>
    %c0_8 = arith.constant 0 : index
    %c0_9 = arith.constant 0 : index
    %9 = vector.load %arg2[%c0_8, %c0_9] : memref<16x32xf32, #tpu.memory_space<vmem>>, vector<16x32xf32>
    %cst_10 = arith.constant dense<0.000000e+00> : vector<16x32xf32>
    %10 = tpu.matmul %9, %8, %cst_10 {dimension_numbers = #tpu.dot_dimension_numbers<[1], [0], [0], [1], [0, 0, 1, 1], [], []>} : vector<16x32xf32>, vector<32x32xf32>, vector<16x32xf32> -> vector<16x32xf32>
    %11 = vector.extract_strided_slice %0 {offsets = [0, 32], sizes = [1, 32], strides = [1, 1]} : vector<1x96xf32> to vector<1x32xf32>
    %12 = vector.broadcast %11 : vector<1x32xf32> to vector<16x32xf32>
    %13 = arith.addf %10, %12 : vector<16x32xf32>
    %c0_11 = arith.constant 0 : index
    %c0_12 = arith.constant 0 : index
    %14 = vector.load %arg7[%c0_11, %c0_12] : memref<16x32xf32, #tpu.memory_space<vmem>>, vector<16x32xf32>
    tpu.vector_store %arg7[%c0_11, %c0_12], %13 {strides = array<i32>} : memref<16x32xf32, #tpu.memory_space<vmem>>, vector<16x32xf32>,
    %c0_13 = arith.constant 0 : index
    %c64 = arith.constant 64 : index
    %15 = vector.load %arg4[%c0_13, %c64] : memref<32x96xf32, #tpu.memory_space<vmem>>, vector<32x32xf32>
    %c0_14 = arith.constant 0 : index
    %c0_15 = arith.constant 0 : index
    %16 = vector.load %arg3[%c0_14, %c0_15] : memref<16x32xf32, #tpu.memory_space<vmem>>, vector<16x32xf32>
    %cst_16 = arith.constant dense<0.000000e+00> : vector<16x32xf32>
    %17 = tpu.matmul %16, %15, %cst_16 {dimension_numbers = #tpu.dot_dimension_numbers<[1], [0], [0], [1], [0, 0, 1, 1], [], []>} : vector<16x32xf32>, vector<32x32xf32>, vector<16x32xf32> -> vector<16x32xf32>
    %18 = vector.extract_strided_slice %0 {offsets = [0, 64], sizes = [1, 32], strides = [1, 1]} : vector<1x96xf32> to vector<1x32xf32>
    %19 = vector.broadcast %18 : vector<1x32xf32> to vector<16x32xf32>
    %20 = arith.addf %17, %19 : vector<16x32xf32>
    %c0_17 = arith.constant 0 : index
    %c0_18 = arith.constant 0 : index
    %21 = vector.load %arg8[%c0_17, %c0_18] : memref<16x32xf32, #tpu.memory_space<vmem>>, vector<16x32xf32>
    tpu.vector_store %arg8[%c0_17, %c0_18], %20 {strides = array<i32>} : memref<16x32xf32, #tpu.memory_space<vmem>>, vector<16x32xf32>,
    return
  }
  func.func @transform_0(%arg0: i32) -> (i32, i32) {
    %c0_i32 = arith.constant 0 : i32
    %c0_i32_0 = arith.constant 0 : i32
    return %arg0, %c0_i32 : i32, i32
  }
  func.func @transform_1(%arg0: i32) -> (i32, i32) {
    %c0_i32 = arith.constant 0 : i32
    %c0_i32_0 = arith.constant 0 : i32
    return %arg0, %c0_i32 : i32, i32
  }
  func.func @transform_2(%arg0: i32) -> (i32, i32) {
    %c0_i32 = arith.constant 0 : i32
    %c0_i32_0 = arith.constant 0 : i32
    return %arg0, %c0_i32 : i32, i32
  }
  func.func @transform_3(%arg0: i32) -> (i32, i32) {
    %c0_i32 = arith.constant 0 : i32
    %c0_i32_0 = arith.constant 0 : i32
    %c0_i32_1 = arith.constant 0 : i32
    return %c0_i32, %c0_i32_0 : i32, i32
  }
  func.func @transform_4(%arg0: i32) -> (i32, i32) {
    %c0_i32 = arith.constant 0 : i32
    %c0_i32_0 = arith.constant 0 : i32
    %c0_i32_1 = arith.constant 0 : i32
    return %c0_i32, %c0_i32_0 : i32, i32
  }
  func.func @transform_5(%arg0: i32) -> (i32, i32) {
    %c0_i32 = arith.constant 0 : i32
    %c0_i32_0 = arith.constant 0 : i32
    return %arg0, %c0_i32 : i32, i32
  }
  func.func @transform_6(%arg0: i32) -> (i32, i32) {
    %c0_i32 = arith.constant 0 : i32
    %c0_i32_0 = arith.constant 0 : i32
    return %arg0, %c0_i32 : i32, i32
  }
  func.func @transform_7(%arg0: i32) -> (i32, i32) {
    %c0_i32 = arith.constant 0 : i32
    %c0_i32_0 = arith.constant 0 : i32
    return %arg0, %c0_i32 : i32, i32
  }
}

</mosaic_0001>

<bundles_post_ra>
// kernel: tpu_custom_call.1
= control target key start
LH: loop header
LB: loop body
LE: loop exit
PB: predicated region body
PF: predicated region fallthrough
CT: control target
= control target key end

     0   :  { %13 = vsyncpa [#allocation3], 0  ;;  %s770_s0 = inlined_call_operand.hbm [shape: f32[16,32], index: 0, kind: input, shape index: {}]   ;;  %s771_s1 = inlined_call_operand.hbm [shape: f32[16,32], index: 1, kind: input, shape index: {}]   ;;  %s772_s2 = inlined_call_operand.hbm [shape: f32[16,32], index: 2, kind: input, shape index: {}]   ;;  %s773_s3 = inlined_call_operand.hbm [shape: f32[32,96], index: 3, kind: input, shape index: {}]   ;;  %s774_s4 = inlined_call_operand.vmem [shape: f32[1,96], index: 4, kind: input, shape index: {}]   ;;  %s775_s5 = inlined_call_operand.hbm [shape: f32[16,32], index: 5, kind: output, shape index: {0}]   ;;  %s776_s6 = inlined_call_operand.hbm [shape: f32[16,32], index: 6, kind: output, shape index: {1}]   ;;  %s777_s7 = inlined_call_operand.hbm [shape: f32[16,32], index: 7, kind: output, shape index: {2}]  }
   0x1   :  { %14 = vsyncpa [#allocation6], 0 }
   0x2   :  { %15 = vsyncpa [#allocation9], 0 }
   0x3   :  { %16 = vsyncpa [#allocation4], 0 }
   0x4   :  { %17 = vsyncpa [#allocation12], 0  ;;  %s662_s24 = smov [#allocation5]   ;;  %s663_s26 = smov [#allocation2]  }
   0x5   :  { %s35_s25 = sshll.u32 %s662_s24, 4  ;;  %s23_s27 = sshll.u32 %s663_s26, 4  ;;  %s36_s25 = int_to_ptr.vmem [resolvable:$true] %s35_s25  ;;  %s24_s27 = int_to_ptr.vmem [resolvable:$true] %s23_s27 }
   0x6   :  { %s520_s28 = scalar_lea.vmem %s36_s25, 256  ;;  %p525_p1 = scmp.lt.s32.totalorder %s36_s25, %s36_s25 }
   0x7   :  { %p521_p0 = scmp.ne.s32.totalorder %s36_s25, %s520_s28  ;;  %p526_p2 = scmp.lt.s32.totalorder %s520_s28, %s520_s28 }
   0x9   :  { %p527_p3 = por %p526_p2, %p525_p1 }
   0xb   :  { %p528_p4 = pnand %p527_p3, %p521_p0 }
   0xd   :  { %531 = shalt.err (!%p528_p4)
}
   0xe   :  { %s664_s29 = smov 128   ;;  %s665_s30 = smov 8  }
   0xf   :  { %41 = dma.hbm_to_vmem [thread:$0]  %s771_s1, 256, %s36_s25, [#allocation6], %s664_s29, %s664_s29, %s665_s30  }
  0x10   :  { %s540_s10 = scalar_lea.vmem %s24_s27, 256  ;;  %p545_p6 = scmp.lt.s32.totalorder %s24_s27, %s24_s27 }
  0x11   :  { %p541_p5 = scmp.ne.s32.totalorder %s24_s27, %s540_s10  ;;  %p546_p7 = scmp.lt.s32.totalorder %s540_s10, %s540_s10 }
  0x13   :  { %p547_p8 = por %p546_p7, %p545_p6 }
  0x15   :  { %p548_p9 = pnand %p547_p8, %p541_p5 }
  0x17   :  { %551 = shalt.err (!%p548_p9)
}
  0x18   :  { %29 = dma.hbm_to_vmem [thread:$0]  %s770_s0, 256, %s24_s27, [#allocation3], %s664_s29, %s664_s29, %s665_s30  }
  0x19   :  { %s666_s13 = smov [#allocation7]   ;;  %s667_s15 = smov [#allocation8]  }
  0x1a   :  { %s47_s14 = sshll.u32 %s666_s13, 4  ;;  %s59_s16 = sshll.u32 %s667_s15, 4  ;;  %s48_s14 = int_to_ptr.vmem [resolvable:$true] %s47_s14  ;;  %s60_s16 = int_to_ptr.vmem [resolvable:$true] %s59_s16 }
  0x1b   :  { %s560_s1 = scalar_lea.vmem %s48_s14, 256  ;;  %p565_p11 = scmp.lt.s32.totalorder %s48_s14, %s48_s14 }
  0x1c   :  { %p561_p10 = scmp.ne.s32.totalorder %s48_s14, %s560_s1  ;;  %p566_p12 = scmp.lt.s32.totalorder %s560_s1, %s560_s1 }
  0x1e   :  { %p567_p13 = por %p566_p12, %p565_p11 }
  0x20   :  { %p568_p0 = pnand %p567_p13, %p561_p10 }
  0x22   :  { %571 = shalt.err (!%p568_p0)
}
  0x23   :  { %53 = dma.hbm_to_vmem [thread:$0]  %s772_s2, 256, %s48_s14, [#allocation6], %s664_s29, %s664_s29, %s665_s30  }
  0x24   :  { %s580_s0 = scalar_lea.vmem %s60_s16, 512  ;;  %p585_p2 = scmp.lt.s32.totalorder %s60_s16, %s60_s16 }
  0x25   :  { %p581_p1 = scmp.ne.s32.totalorder %s60_s16, %s580_s0  ;;  %p586_p3 = scmp.lt.s32.totalorder %s580_s0, %s580_s0 }
  0x27   :  { %p587_p4 = por %p586_p3, %p585_p2 }
  0x29   :  { %p588_p5 = pnand %p587_p4, %p581_p1 }
  0x2b   :  { %591 = shalt.err (!%p588_p5)
}
  0x2c   :  { %65 = dma.hbm_to_vmem [thread:$0]  %s773_s3, 512, %s60_s16, [#allocation9], %s664_s29, %s664_s29, %s665_s30  }
  0x2d   :  { %652 = dma.done.wait [#allocation3], 256  }
  0x2e   :  { %653 = vsyncadd [#allocation3], 4294967040 }
  0x2f   :  { %654 = dma.done.wait [#allocation6], 512  }
  0x30   :  { %655 = vsyncadd [#allocation6], 4294966784 }
  0x31   :  { %656 = dma.done.wait [#allocation9], 512  }
  0x32   :  { %657 = vsyncadd [#allocation9], 4294966784  ;;  %vm93_vm0 = vcmask 261120   ;;  %v180_v0 = vld [vmem:[#allocation8 + $0x18] sm:$0xff]  ;;  %v179_v1 = vld [vmem:[#allocation8 + $0x10] sm:$0xff]  ;;  %s668_s2 = smov 96  }
  0x33   :  { %193 = vrot.lane.b32.xlu0 %v180_v0, %s668_s2  ;;  %191 = vrot.lane.b32.xlu1 %v179_v1, %s668_s2  ;;  %v85_v2 = vld [vmem:[#allocation2] sm:$0xff]  ;;  %v181_v3 = vld [vmem:[#allocation5] sm:$0xff]  ;;  %s669_s3 = smov 64   ;;  %v286_v4 = vld [vmem:[#allocation8 + $0x8] sm:$0xff] }
  0x34   :  { %468 = vmatprep.subr.mxu0 %v180_v0  ;;  %476 = vmatprep.mubr.msk.f32.mxu0 %vm93_vm0, %v85_v2  ;;  %v285_v5 = vld [vmem:[#allocation8] sm:$0xff]  ;;  %v86_v6 = vld [vmem:[#allocation2 + $0x8] sm:$0xff]  ;;  %v289_v7 = vld [vmem:[#allocation7] sm:$0xff] }
  0x35   :  { %469 = vmatpush3.msra.mxu0 %v180_v0  ;;  %487 = vmatprep.mubr.msk.f32.mxu1 %vm93_vm0, %v181_v3  ;;  %v443_v8 = vld [vmem:[%s774_s4] ss:$0 sm:$0xff]  ;;  %v182_v17 = vld [vmem:[#allocation5 + $0x8] sm:$0xff]  ;;  %v290_v18 = vld [vmem:[#allocation7 + $0x8] sm:$0xff]  ;;  %s670_s4 = smov [#allocation10]  }
  0x36   :  { %470 = vmatprep.subr.mxu0 %v179_v1  ;;  %s398_s23 = sshll.u32 %s670_s4, 4  ;;  %s399_s23 = int_to_ptr.vmem [resolvable:$true] %s398_s23 }
  0x37   :  { %301 = vrot.lane.b32.xlu0 %v180_v0, %s669_s3  ;;  %299 = vrot.lane.b32.xlu1 %v179_v1, %s669_s3  ;;  %s592_s24 = scalar_lea.vmem %s399_s23, 256  ;;  %p597_p7 = scmp.lt.s32.totalorder %s399_s23, %s399_s23 }
  0x38   :  { %471 = vmatpush3.msra.mxu0 %v179_v1  ;;  %p593_p6 = scmp.ne.s32.totalorder %s399_s23, %s592_s24  ;;  %p598_p8 = scmp.lt.s32.totalorder %s592_s24, %s592_s24 }
  0x39   :  { %472 = vmatprep.subr.mxu0 %v286_v4 }
  0x3a   :  { %473 = vmatpush3.msra.mxu0 %v286_v4  ;;  %p599_p9 = por %p598_p8, %p597_p7 }
  0x3b   :  { %297 = vrot.lane.b32.xlu1 %v286_v4, %s669_s3  ;;  %189 = vrot.lane.b32.xlu0 %v286_v4, %s668_s2 }
  0x3c   :  { %474 = vmatprep.subr.mxu0 %v285_v5  ;;  %p600_p10 = pnand %p599_p9, %p593_p6 }
  0x3d   :  { %475 = vmatpush3.msra.mxu0 %v285_v5 }
  0x3e   :  { %477 = vmatmul.mubr.msk.f32.vlgmr.msra.gmra.mxu0 %vm93_vm0, %v86_v6 }
  0x3f   :  { %295 = vrot.lane.b32.xlu1 %v285_v5, %s669_s3  ;;  %187 = vrot.lane.b32.xlu0 %v285_v5, %s668_s2 }
  0x40   :  { %498 = vmatprep.mubr.msk.f32.mxu0 %vm93_vm0, %v289_v7 }
  0x43   :  { %199 = vrot.lane.b32.xlu0 %v443_v8, %s668_s2  ;;  %307 = vrot.lane.b32.xlu1 %v443_v8, %s669_s3 }
  0xa5   :  { %v194_v9 = vpop.permute.xlu0 %193  ;;  %v192_v10 = vpop.permute.xlu1 %191 }
  0xa6   :  { %479 = vmatprep.subr.mxu1 %v194_v9 }
  0xa7   :  { %480 = vmatpush3.msra.mxu1 %v194_v9 }
  0xa8   :  { %481 = vmatprep.subr.mxu1 %v192_v10 }
  0xa9   :  { %v302_v11 = vpop.permute.xlu0 %301  ;;  %482 = vmatpush3.msra.mxu1 %v192_v10  ;;  %v300_v12 = vpop.permute.xlu1 %299 }
  0xaa   :  { %490 = vmatprep.subr.mxu0 %v302_v11 }
  0xab   :  { %491 = vmatpush3.msra.mxu0 %v302_v11 }
  0xac   :  { %492 = vmatprep.subr.mxu0 %v300_v12 }
  0xad   :  { %v298_v13 = vpop.permute.xlu1 %297  ;;  %v190_v14 = vpop.permute.xlu0 %189  ;;  %493 = vmatpush3.msra.mxu0 %v300_v12 }
  0xae   :  { %483 = vmatprep.subr.mxu1 %v190_v14  ;;  %494 = vmatprep.subr.mxu0 %v298_v13 }
  0xaf   :  { %484 = vmatpush3.msra.mxu1 %v190_v14  ;;  %495 = vmatpush3.msra.mxu0 %v298_v13 }
  0xb1   :  { %v296_v15 = vpop.permute.xlu1 %295  ;;  %v188_v16 = vpop.permute.xlu0 %187 }
  0xb2   :  { %485 = vmatprep.subr.mxu1 %v188_v16  ;;  %496 = vmatprep.subr.mxu0 %v296_v15 }
  0xb3   :  { %486 = vmatpush3.msra.mxu1 %v188_v16  ;;  %497 = vmatpush3.msra.mxu0 %v296_v15 }
  0xb4   :  { %488 = vmatmul.mubr.msk.f32.vlgmr.msra.gmra.mxu1 %vm93_vm0, %v182_v17  ;;  %499 = vmatmul.mubr.msk.f32.vlgmr.msra.gmra.mxu0 %vm93_vm0, %v290_v18 }
  0xfe   :  { %v478_v19 = vpop.f32.mrf.mxu0 }
  0xff   :  { %v172_v20 = vadd.f32 %v478_v19, %v443_v8 }
 0x100   :  { %v166_v21 = vpop.f32.mrf.mxu0 }
 0x101   :  { %176 = vst.msk [vmem:[#allocation10 + $0x8] sm:$0xff] %vm93_vm0, %v172_v20  ;;  %v167_v22 = vadd.f32 %v443_v8, %v166_v21 }
 0x103   :  { %175 = vst.msk [vmem:[#allocation10] sm:$0xff] %vm93_vm0, %v167_v22 }
 0x104   :  { %603 = shalt.err (!%p600_p10)
}
 0x105   :  { %404 = dma.vmem_to_hbm [thread:$0]  %s399_s23, 256, %s775_s5, [#allocation4], %s664_s29, %s664_s29, %s665_s30   ;;  %v200_v23 = vpop.permute.xlu0 %199  ;;  %v308_v24 = vpop.permute.xlu1 %307 }
 0x106   :  { %s671_s27 = smov [#allocation11]   ;;  %s672_s8 = smov [#allocation13]  }
 0x107   :  { %s410_s28 = sshll.u32 %s671_s27, 4  ;;  %s422_s9 = sshll.u32 %s672_s8, 4  ;;  %s411_s28 = int_to_ptr.vmem [resolvable:$true] %s410_s28  ;;  %s423_s9 = int_to_ptr.vmem [resolvable:$true] %s422_s9 }
 0x108   :  { %s612_s5 = scalar_lea.vmem %s411_s28, 256  ;;  %p617_p12 = scmp.lt.s32.totalorder %s411_s28, %s411_s28 }
 0x109   :  { %p613_p11 = scmp.ne.s32.totalorder %s411_s28, %s612_s5  ;;  %p618_p13 = scmp.lt.s32.totalorder %s612_s5, %s612_s5 }
 0x10b   :  { %p619_p0 = por %p618_p13, %p617_p12 }
 0x10d   :  { %p620_p1 = pnand %p619_p0, %p613_p11 }
 0x174   :  { %v489_v25 = vpop.f32.mrf.mxu1  ;;  %v500_v26 = vpop.f32.mrf.mxu0 }
 0x175   :  { %v280_v27 = vadd.f32 %v489_v25, %v200_v23  ;;  %v388_v28 = vadd.f32 %v500_v26, %v308_v24 }
 0x176   :  { %v274_v29 = vpop.f32.mrf.mxu1  ;;  %v382_v30 = vpop.f32.mrf.mxu0 }
 0x177   :  { %284 = vst.msk [vmem:[#allocation11 + $0x8] sm:$0xff] %vm93_vm0, %v280_v27  ;;  %392 = vst.msk [vmem:[#allocation13 + $0x8] sm:$0xff] %vm93_vm0, %v388_v28  ;;  %v275_v31 = vadd.f32 %v274_v29, %v200_v23  ;;  %v383_v32 = vadd.f32 %v382_v30, %v308_v24 }
 0x179   :  { %283 = vst.msk [vmem:[#allocation11] sm:$0xff] %vm93_vm0, %v275_v31  ;;  %391 = vst.msk [vmem:[#allocation13] sm:$0xff] %vm93_vm0, %v383_v32 }
 0x17a   :  { %623 = shalt.err (!%p620_p1)
}
 0x17b   :  { %416 = dma.vmem_to_hbm [thread:$0]  %s411_s28, 256, %s776_s6, [#allocation12], %s664_s29, %s664_s29, %s665_s30  }
 0x17c   :  { %s632_s12 = scalar_lea.vmem %s423_s9, 256  ;;  %p637_p3 = scmp.lt.s32.totalorder %s423_s9, %s423_s9 }
 0x17d   :  { %p633_p2 = scmp.ne.s32.totalorder %s423_s9, %s632_s12  ;;  %p638_p4 = scmp.lt.s32.totalorder %s632_s12, %s632_s12 }
 0x17f   :  { %p639_p5 = por %p638_p4, %p637_p3 }
 0x181   :  { %p640_p6 = pnand %p639_p5, %p633_p2 }
 0x183   :  { %643 = shalt.err (!%p640_p6)
}
 0x184   :  { %428 = dma.vmem_to_hbm [thread:$0]  %s423_s9, 256, %s777_s7, [#allocation12], %s664_s29, %s664_s29, %s665_s30  }
 0x185   :  { %658 = dma.done.wait [#allocation4], 256  }
 0x186   :  { %659 = vsyncadd [#allocation4], 4294967040 }
 0x187   :  { %660 = dma.done.wait [#allocation12], 512  }
 0x188   :  { %661 = vsyncadd [#allocation12], 4294966784 }
 0x189   :  { %438 = vsyncpa [#allocation3], 1 }
 0x18a   :  { %439 = vsyncpa [#allocation6], 1 }
 0x18b   :  { %440 = vsyncpa [#allocation9], 1 }
 0x18c   :  { %441 = vsyncpa [#allocation4], 1 }
 0x18d   :  { %442 = vsyncpa [#allocation12], 1 }

</bundles_post_ra>
